<compile_context>
chip_gen: v6e
topology: v6e:2x2x1
jax: 0.10.0
libtpu: 0.0.40
codegen_flags: <defaults>
</compile_context>

<pallas_src>
import functools
import numpy as np
import jax
import jax.numpy as jnp
from jax import lax
from jax.experimental import pallas as pl
from jax.experimental.pallas import tpu as pltpu


def _round_up(x, m):
    return (x + m - 1) // m * m


# ---------------------------------------------------------------------------
# Kernel: one (batch, channel-tile) pair per grid step.
#
#   xp_ref   : (1, NrowsP, Kx)   tap-packed, zero-padded, flattened NHWC image
#                                (channels = [x | noise | ones | 0...] per tap
#                                 slot; Kx = ndx * Ka_p, ndx in {3, 9}).
#   tapw_ref : (ngroups, Kx, Ct) conv weights (conv_scale folded; noise_scale
#                                and bias*scale on the centre tap's extra rows).
#   s_ref    : (1, 1, Ct)        precomputed AdaIN scale row for this batch.
#   t_ref    : (1, 1, Ct)        precomputed AdaIN shift row for this batch.
#   out_ref  : (1, Nz, Ct)       Nz = H*Wp8 rows; columns w in [W, Wp8) are
#                                row-wrap garbage, sliced off by the wrapper.
# ---------------------------------------------------------------------------
def _convnoisenorm_kernel(xp_ref, tapw_ref, s_ref, t_ref, out_ref, *,
                          H, W, Wp8, ngroups, ndx, ka_p, c_in,
                          neg_slope, eps):
    Nz, Ct = out_ref.shape[1], out_ref.shape[2]

    # Centre tap (dy=1, dx=1) location inside the packed layout.
    cg, cw = 4 // ndx, 4 % ndx
    mcol = cw * ka_p + c_in + 1            # "ones" channel column = valid mask

    # --- conv + noise + bias: 1 (or 3) sublane-aligned accumulating dots ----
    acc = jnp.zeros((Nz, Ct), jnp.float32)
    mask = None
    for g in range(ngroups):               # ngroups in {1, 3}; fully unrolled
        off = g * Wp8                       # multiple of 8 -> aligned slice
        xg = xp_ref[0, off:off + Nz, :]     # (Nz, Kx), bf16 or f32
        if g == cg:
            # The centre tap's ones-channel is exactly 1 at valid output
            # pixels and 0 at padding / wrap rows: reuse it as the IN mask.
            mask = xg[:, mcol:mcol + 1].astype(jnp.float32)   # (Nz, 1)
        acc = acc + jnp.dot(xg, tapw_ref[g],
                            preferred_element_type=jnp.float32)

    # --- LeakyReLU(0.2) + fused one-pass masked instance-norm statistics ----
    y = jnp.maximum(acc, neg_slope * acc)                      # (Nz, Ct) f32
    ym = y * mask
    inv_n = 1.0 / (H * W)
    s1 = jnp.sum(ym, axis=0, keepdims=True) * inv_n            # E[y]
    s2 = jnp.sum(ym * y, axis=0, keepdims=True) * inv_n        # E[y^2]
    var = s2 - s1 * s1                                         # biased var

    # --- AdaIN folded into a single affine: out = y*gain + bias -------------
    gain = lax.rsqrt(var + eps) * s_ref[0]                     # (1, Ct)
    bias = t_ref[0] - s1 * gain                                # (1, Ct)
    out_ref[0] = (y * gain + bias).astype(out_ref.dtype)


def _derive_vmem_limit(nrows_p, kx, ngroups, nz, ct, in_itemsize):
    """Scoped-VMEM limit from lane-padded block sizes (+ in-kernel temps)."""
    lane = lambda n: _round_up(n, 128)
    x_blk = _round_up(nrows_p, 8) * lane(kx) * in_itemsize
    w_blk = ngroups * _round_up(kx, 8) * lane(ct) * in_itemsize
    o_blk = _round_up(nz, 8) * lane(ct) * 4
    st_blk = 2 * 8 * lane(ct) * 4
    need = 2 * (x_blk + w_blk + o_blk + st_blk)      # double-buffered IO
    need += 4 * nz * lane(ct) * 4                    # acc / y / ym / out temps
    try:
        cap = pltpu.get_tpu_info().vmem_capacity_bytes
    except Exception:
        cap = 64 * 1024 * 1024                       # v7x per-TC physical VMEM
    return int(min(max(32 * 1024 * 1024, int(1.25 * need)), int(0.80 * cap)))


def conv_noise_norm(x_nchw, w, noise_nchw, params, *,
                    compute_dtype=jnp.bfloat16, c_tile=128):
    """Pallas forward. x_nchw: [B,Cin,H,W], w: [B,w_dim], noise: [B,1,H,W]."""
    B, C_in, H, W = x_nchw.shape
    w_dim = w.shape[1]
    conv_w = params["conv_w"]                         # (Cout, Cin, 3, 3)
    C_out = conv_w.shape[0]

    Ka = C_in + 2                                     # + noise + ones channels
    Ka_p = _round_up(Ka, 8)
    Hp = H + 2
    Wp8 = _round_up(W + 2, 8)                         # sublane-aligned dy shifts
    Nz = H * Wp8                                      # out rows incl. wrap garbage
    C_pad = _round_up(C_out, c_tile)
    Ct = min(c_tile, C_pad)
    n_ct = C_pad // Ct

    # Tap packing: one fused dot when the packed K fits a single 128-lane MXU
    # pass, otherwise pack the 3 dx taps host-side and accumulate over dy.
    ndx = 9 if 9 * Ka_p <= 128 else 3
    ngroups = 9 // ndx
    Kx = ndx * Ka_p

    conv_scale = float((2.0 / (C_in * 9)) ** 0.5)
    lin_scale = float((2.0 / w_dim) ** 0.5)
    f32 = jnp.float32
    cdt = compute_dtype

    # ---- augmented padded image [x | noise | ones | 0...] (compute dtype) ---
    x_nhwc = jnp.transpose(x_nchw, (0, 2, 3, 1))
    noise = noise_nchw.reshape(B, H, W, 1)
    ones = jnp.ones((B, H, W, 1), x_nchw.dtype)
    aug = jnp.concatenate([x_nhwc, noise, ones], axis=-1).astype(cdt)  # (B,H,W,Ka)
    aug = jnp.pad(aug, ((0, 0), (1, 1), (1, Wp8 - W - 1), (0, Ka_p - Ka)))
    xa_flat = aug.reshape(B, Hp * Wp8, Ka_p)
    xa_flat = jnp.pad(xa_flat, ((0, 0), (0, 8), (0, 0)))   # dx/dy shift headroom

    if ndx == 9:
        nrows_p = Nz
        offs = [dy * Wp8 + dx for dy in range(3) for dx in range(3)]
    else:
        nrows_p = Hp * Wp8
        offs = [0, 1, 2]
    xp = jnp.concatenate([xa_flat[:, o:o + nrows_p, :] for o in offs],
                         axis=-1)                          # (B, nrows_p, Kx)

    # ---- tap weights: conv_scale / noise_scale / bias folded in -------------
    wt = jnp.transpose(conv_w, (2, 3, 1, 0)).astype(f32) * conv_scale  # (3,3,Cin,Cout)
    tapw = jnp.zeros((ngroups, Kx, C_pad), f32)
    for dy in range(3):
        for dx in range(3):
            t = dy * 3 + dx
            g, wi = t // ndx, t % ndx
            tapw = tapw.at[g, wi * Ka_p:wi * Ka_p + C_in, :C_out].set(wt[dy, dx])
    g4, w4 = 4 // ndx, 4 % ndx
    tapw = tapw.at[g4, w4 * Ka_p + C_in, :C_out].set(
        params["noise_scale"].astype(f32))
    tapw = tapw.at[g4, w4 * Ka_p + C_in + 1, :C_out].set(
        params["conv_b"].astype(f32) * conv_scale)
    tapw = tapw.astype(cdt)

    # ---- AdaIN style rows: hoisted single matmul over the whole batch -------
    wf = w.astype(f32) * lin_scale
    s_rows = wf @ params["scale_w"].astype(f32).T + params["scale_b"].astype(f32) * lin_scale
    t_rows = wf @ params["shift_w"].astype(f32).T + params["shift_b"].astype(f32) * lin_scale
    s_all = jnp.zeros((B, 1, C_pad), f32).at[:, 0, :C_out].set(s_rows)
    t_all = jnp.zeros((B, 1, C_pad), f32).at[:, 0, :C_out].set(t_rows)

    kernel = functools.partial(
        _convnoisenorm_kernel, H=H, W=W, Wp8=Wp8, ngroups=ngroups, ndx=ndx,
        ka_p=Ka_p, c_in=C_in, neg_slope=0.2, eps=1e-5)

    vmem_limit = _derive_vmem_limit(nrows_p, Kx, ngroups, Nz, Ct,
                                    jnp.dtype(cdt).itemsize)

    out_flat = pl.pallas_call(
        kernel,
        out_shape=jax.ShapeDtypeStruct((B, Nz, C_pad), f32),
        grid_spec=pltpu.PrefetchScalarGridSpec(
            num_scalar_prefetch=0,
            grid=(B, n_ct),
            in_specs=[
                # image: constant across the channel axis -> stays resident
                pl.BlockSpec((1, nrows_p, Kx), lambda b, c: (b, 0, 0)),
                # tap weights: channel-tiled
                pl.BlockSpec((ngroups, Kx, Ct), lambda b, c: (0, 0, c)),
                # precomputed AdaIN scale / shift rows
                pl.BlockSpec((1, 1, Ct), lambda b, c: (b, 0, c)),
                pl.BlockSpec((1, 1, Ct), lambda b, c: (b, 0, c)),
            ],
            out_specs=pl.BlockSpec((1, Nz, Ct), lambda b, c: (b, 0, c)),
        ),
        compiler_params=pltpu.CompilerParams(
            dimension_semantics=("parallel", "parallel"),   # v7x megacore
            vmem_limit_bytes=vmem_limit,
        ),
    )(xp, tapw, s_all, t_all)

    # Strip wrap-garbage columns + channel padding, back to NCHW.
    out = out_flat.reshape(B, H, Wp8, C_pad)[:, :, :W, :C_out]
    return jnp.transpose(out, (0, 3, 1, 2))


# ---------------------------------------------------------------------------
# Pure-JAX reference (mirrors the PyTorch module) for the correctness check.
# ---------------------------------------------------------------------------
def reference_forward(x, w, noise, params):
    B, C_in, H, W = x.shape
    w_dim = w.shape[1]
    conv_scale = (2.0 / (C_in * 9)) ** 0.5
    lin_scale = (2.0 / w_dim) ** 0.5

    y = lax.conv_general_dilated(
        x * conv_scale, params["conv_w"], (1, 1), ((1, 1), (1, 1)),
        dimension_numbers=("NCHW", "OIHW", "NCHW"))
    y = y + (params["conv_b"] * conv_scale)[None, :, None, None]
    y = y + params["noise_scale"][None, :, None, None] * noise
    y = jnp.where(y >= 0, y, 0.2 * y)
    mean = jnp.mean(y, axis=(2, 3), keepdims=True)
    var = jnp.mean((y - mean) ** 2, axis=(2, 3), keepdims=True)
    yn = (y - mean) / jnp.sqrt(var + 1e-5)
    s = (w * lin_scale) @ params["scale_w"].T + params["scale_b"] * lin_scale
    t = (w * lin_scale) @ params["shift_w"].T + params["shift_b"] * lin_scale
    return s[:, :, None, None] * yn + t[:, :, None, None]


def _make_params(key, c_in, c_out, w_dim):
    kcw, kcb, kns, ksw, ksb, ktw, ktb = jax.random.split(key, 7)
    # The torch __init__ zeroes conv bias / noise scale / style biases; small
    # nonzero values are used here so every fused term is actually exercised.
    return {
        "conv_w": jax.random.normal(kcw, (c_out, c_in, 3, 3), jnp.float32),
        "conv_b": 0.1 * jax.random.normal(kcb, (c_out,), jnp.float32),
        "noise_scale": 0.1 * jax.random.normal(kns, (c_out,), jnp.float32),
        "scale_w": jax.random.normal(ksw, (c_out, w_dim), jnp.float32),
        "scale_b": 0.1 * jax.random.normal(ksb, (c_out,), jnp.float32),
        "shift_w": jax.random.normal(ktw, (c_out, w_dim), jnp.float32),
        "shift_b": 0.1 * jax.random.normal(ktb, (c_out,), jnp.float32),
    }


def _run_case(key, B, c_in, c_out, img, w_dim, compute_dtype, tol):
    kp, kx, kw, kn = jax.random.split(key, 4)
    params = _make_params(kp, c_in, c_out, w_dim)
    x = jax.random.normal(kx, (B, c_in, img, img), jnp.float32)
    w = jax.random.normal(kw, (B, w_dim), jnp.float32)
    # torch.randn noise from InjectNoise, generated deterministically here.
    noise = jax.random.normal(kn, (B, 1, img, img), jnp.float32)

    fwd = jax.jit(functools.partial(conv_noise_norm, compute_dtype=compute_dtype))
    out = jax.block_until_ready(fwd(x, w, noise, params))
    ref = jax.block_until_ready(reference_forward(x, w, noise, params))
    np.testing.assert_allclose(np.asarray(out), np.asarray(ref),
                               rtol=tol, atol=tol)


if __name__ == "__main__":
    key = jax.random.PRNGKey(0)
    k1, k2, k3 = jax.random.split(key, 3)

    # Narrow-C_in layer: fully fused single-dot conv path (ndx=9), strict f32.
    _run_case(k1, B=2, c_in=4, c_out=8, img=16, w_dim=8,
              compute_dtype=jnp.float32, tol=5e-4)
    # Same layer on the bf16 MXU fast path (looser tolerance: bf16 inputs).
    _run_case(k2, B=2, c_in=4, c_out=8, img=16, w_dim=8,
              compute_dtype=jnp.bfloat16, tol=5e-2)
    # Wider layer: dx-packed 3-dot path + 2 channel tiles (grid=(B, 2)).
    _run_case(k3, B=2, c_in=40, c_out=160, img=8, w_dim=16,
              compute_dtype=jnp.float32, tol=5e-4)

    print("KERNEL_OK")
</pallas_src>

<mosaic_0001>
module attributes {stable_mosaic.version = 11 : i64} {
  func.func @_convnoisenorm_kernel(%arg0: i32, %arg1: i32, %arg2: memref<1x384x72xf32, #tpu.memory_space<vmem>>, %arg3: memref<1x72x128xf32, #tpu.memory_space<vmem>>, %arg4: memref<1x1x128xf32, #tpu.memory_space<vmem>>, %arg5: memref<1x1x128xf32, #tpu.memory_space<vmem>>, %arg6: memref<1x384x128xf32, #tpu.memory_space<vmem>>) attributes {dimension_semantics = [#tpu.dimension_semantics<parallel>, #tpu.dimension_semantics<parallel>], iteration_bounds = array<i64: 2, 1>, scalar_prefetch = 0 : i64, scratch_operands = 0 : i64, tpu.core_type = #tpu.core_type<tc>, window_params = [{transform_indices = @transform_0, window_bounds = array<i64: 1, 384, 72>}, {transform_indices = @transform_1, window_bounds = array<i64: 1, 72, 128>}, {transform_indices = @transform_2, window_bounds = array<i64: 1, 1, 128>}, {transform_indices = @transform_3, window_bounds = array<i64: 1, 1, 128>}, {transform_indices = @transform_4, window_bounds = array<i64: 1, 384, 128>}]} {
    %cst = arith.constant 0.000000e+00 : f32
    %0 = vector.broadcast %cst : f32 to vector<384x128xf32>
    %c0 = arith.constant 0 : index
    %c0_0 = arith.constant 0 : index
    %c0_1 = arith.constant 0 : index
    %1 = vector.load %arg2[%c0, %c0_0, %c0_1] : memref<1x384x72xf32, #tpu.memory_space<vmem>>, vector<1x384x72xf32>
    %2 = vector.shape_cast %1 : vector<1x384x72xf32> to vector<384x72xf32>
    %3 = vector.extract_strided_slice %2 {offsets = [0, 37], sizes = [384, 1], strides = [1, 1]} : vector<384x72xf32> to vector<384x1xf32>
    %c0_2 = arith.constant 0 : index
    %c0_3 = arith.constant 0 : index
    %c0_4 = arith.constant 0 : index
    %4 = vector.load %arg3[%c0_2, %c0_3, %c0_4] : memref<1x72x128xf32, #tpu.memory_space<vmem>>, vector<1x72x128xf32>
    %5 = vector.shape_cast %4 : vector<1x72x128xf32> to vector<72x128xf32>
    %cst_5 = arith.constant dense<0.000000e+00> : vector<384x128xf32>
    %6 = tpu.matmul %2, %5, %cst_5 {dimension_numbers = #tpu.dot_dimension_numbers<[1], [0], [0], [1], [0, 0, 1, 1], [], []>} : vector<384x72xf32>, vector<72x128xf32>, vector<384x128xf32> -> vector<384x128xf32>
    %7 = arith.addf %0, %6 : vector<384x128xf32>
    %cst_6 = arith.constant 2.000000e-01 : f32
    %8 = vector.broadcast %cst_6 : f32 to vector<384x128xf32>
    %9 = arith.mulf %8, %7 : vector<384x128xf32>
    %10 = arith.maximumf %7, %9 : vector<384x128xf32>
    %11 = vector.broadcast %3 : vector<384x1xf32> to vector<384x128xf32>
    %12 = arith.mulf %10, %11 : vector<384x128xf32>
    %cst_7 = arith.constant dense<0.000000e+00> : vector<128xf32>
    %13 = vector.multi_reduction <add>, %12, %cst_7 [0] : vector<384x128xf32> to vector<128xf32>
    %14 = vector.shape_cast %13 : vector<128xf32> to vector<1x128xf32>
    %cst_8 = arith.constant 3.906250e-03 : f32
    %15 = vector.broadcast %cst_8 : f32 to vector<1x128xf32>
    %16 = arith.mulf %14, %15 : vector<1x128xf32>
    %17 = arith.mulf %12, %10 : vector<384x128xf32>
    %cst_9 = arith.constant dense<0.000000e+00> : vector<128xf32>
    %18 = vector.multi_reduction <add>, %17, %cst_9 [0] : vector<384x128xf32> to vector<128xf32>
    %19 = vector.shape_cast %18 : vector<128xf32> to vector<1x128xf32>
    %cst_10 = arith.constant 3.906250e-03 : f32
    %20 = vector.broadcast %cst_10 : f32 to vector<1x128xf32>
    %21 = arith.mulf %19, %20 : vector<1x128xf32>
    %22 = arith.mulf %16, %16 : vector<1x128xf32>
    %23 = arith.subf %21, %22 : vector<1x128xf32>
    %cst_11 = arith.constant 9.99999974E-6 : f32
    %24 = vector.broadcast %cst_11 : f32 to vector<1x128xf32>
    %25 = arith.addf %23, %24 : vector<1x128xf32>
    %26 = math.rsqrt %25 : vector<1x128xf32>
    %c0_12 = arith.constant 0 : index
    %c0_13 = arith.constant 0 : index
    %c0_14 = arith.constant 0 : index
    %27 = vector.load %arg4[%c0_12, %c0_13, %c0_14] : memref<1x1x128xf32, #tpu.memory_space<vmem>>, vector<1x1x128xf32>
    %28 = vector.shape_cast %27 : vector<1x1x128xf32> to vector<1x128xf32>
    %29 = arith.mulf %26, %28 : vector<1x128xf32>
    %c0_15 = arith.constant 0 : index
    %c0_16 = arith.constant 0 : index
    %c0_17 = arith.constant 0 : index
    %30 = vector.load %arg5[%c0_15, %c0_16, %c0_17] : memref<1x1x128xf32, #tpu.memory_space<vmem>>, vector<1x1x128xf32>
    %31 = vector.shape_cast %30 : vector<1x1x128xf32> to vector<1x128xf32>
    %32 = arith.mulf %16, %29 : vector<1x128xf32>
    %33 = arith.subf %31, %32 : vector<1x128xf32>
    %34 = vector.broadcast %29 : vector<1x128xf32> to vector<384x128xf32>
    %35 = arith.mulf %10, %34 : vector<384x128xf32>
    %36 = vector.broadcast %33 : vector<1x128xf32> to vector<384x128xf32>
    %37 = arith.addf %35, %36 : vector<384x128xf32>
    %c0_18 = arith.constant 0 : index
    %c0_19 = arith.constant 0 : index
    %c0_20 = arith.constant 0 : index
    %38 = vector.load %arg6[%c0_18, %c0_19, %c0_20] : memref<1x384x128xf32, #tpu.memory_space<vmem>>, vector<1x384x128xf32>
    %39 = vector.shape_cast %38 : vector<1x384x128xf32> to vector<384x128xf32>
    %40 = vector.shape_cast %37 : vector<384x128xf32> to vector<1x384x128xf32>
    tpu.vector_store %arg6[%c0_18, %c0_19, %c0_20], %40 {strides = array<i32>} : memref<1x384x128xf32, #tpu.memory_space<vmem>>, vector<1x384x128xf32>,
    return
  }
  func.func @transform_0(%arg0: i32, %arg1: i32) -> (i32, i32, i32) {
    %c0_i32 = arith.constant 0 : i32
    %c0_i32_0 = arith.constant 0 : i32
    %c0_i32_1 = arith.constant 0 : i32
    return %arg0, %c0_i32, %c0_i32_0 : i32, i32, i32
  }
  func.func @transform_1(%arg0: i32, %arg1: i32) -> (i32, i32, i32) {
    %c0_i32 = arith.constant 0 : i32
    %c0_i32_0 = arith.constant 0 : i32
    %c0_i32_1 = arith.constant 0 : i32
    return %c0_i32, %c0_i32_0, %arg1 : i32, i32, i32
  }
  func.func @transform_2(%arg0: i32, %arg1: i32) -> (i32, i32, i32) {
    %c0_i32 = arith.constant 0 : i32
    %c0_i32_0 = arith.constant 0 : i32
    return %arg0, %c0_i32, %arg1 : i32, i32, i32
  }
  func.func @transform_3(%arg0: i32, %arg1: i32) -> (i32, i32, i32) {
    %c0_i32 = arith.constant 0 : i32
    %c0_i32_0 = arith.constant 0 : i32
    return %arg0, %c0_i32, %arg1 : i32, i32, i32
  }
  func.func @transform_4(%arg0: i32, %arg1: i32) -> (i32, i32, i32) {
    %c0_i32 = arith.constant 0 : i32
    %c0_i32_0 = arith.constant 0 : i32
    return %arg0, %c0_i32, %arg1 : i32, i32, i32
  }
}

</mosaic_0001>

<bundles_post_ra>
// kernel: conv_noise_norm.1
= control target key start
LH: loop header
LB: loop body
LE: loop exit
PB: predicated region body
PF: predicated region fallthrough
CT: control target
= control target key end

     0   :  { %s1867_s15 = smov 0   ;;  %s1869_s16 = smov 0   ;;  %s2652_s0 = inlined_call_operand.vmem [shape: f32[2,384,72], index: 0, kind: input, shape index: {}]   ;;  %s2653_s1 = inlined_call_operand.vmem [shape: f32[1,72,128], index: 1, kind: input, shape index: {}]   ;;  %s2654_s2 = inlined_call_operand.vmem [shape: f32[2,1,128], index: 2, kind: input, shape index: {}]   ;;  %s2655_s3 = inlined_call_operand.vmem [shape: f32[2,1,128], index: 3, kind: input, shape index: {}]   ;;  %s2656_s4 = inlined_call_operand.vmem [shape: f32[2,384,128], index: 4, kind: output, shape index: {}]  }
   0x1   :  { %s1871_s17 = smov 0  }
   0x2 LB: > { %s26_s18 = sadd.s32 1, %s1835_s16  ;;  %p1569_p0 = scmp.ge.s32.totalorder %s1839_s17, 1  ;;  %s1839_s17 = sphi %s1871_s17, %s14_s17   ;;  %s1835_s16 = sphi %s1869_s16, %s2685_s16   ;;  %s1831_s15 = sphi %s1867_s15, %s2684_s15  }
   0x3   : > { %p28_p1 = scmp.ge.s32.totalorder %s26_s18, 2  ;;  %p211_p2 = scmp.lt.s32.totalorder %s1839_s17, 3 }
   0x5   : > { %s2687_s18 = smov (%p28_p1, %s26_s18), 0  ;;  %p212_p3 = pnand %p1569_p0, %p211_p2 }
   0x7   : > { %215 = sbr.rel (%p212_p3) target bundleno = 412 (0x19c), region = 36 }
   0xc   : > { %v341_v0 = vld [vmem:[%s2653_s1 + $0x40] sm:$0xff]  ;;  %v340_v1 = vld [vmem:[%s2653_s1 + $0x38] sm:$0xff]  ;;  %p256_p4 = scmp.lt.s32.totalorder %s1831_s15, 1  ;;  %v339_v2 = vld [vmem:[%s2653_s1 + $0x30] sm:$0xff]  ;;  %v1841_v4 = vmov 37   ;;  %vm342_vm0 = vcmask 588800  }
   0xd   : > { %1679 = vmatprep.subr.mxu0 %v341_v0  ;;  %1769 = vmatprep.subr.mxu1 %v341_v0  ;;  %v338_v3 = vld [vmem:[%s2653_s1 + $0x28] sm:$0xff]  ;;  %v337_v7 = vld [vmem:[%s2653_s1 + $0x20] sm:$0xff]  ;;  %v336_v8 = vld [vmem:[%s2653_s1 + $0x18] sm:$0xff] }
   0xe   : > { %1680 = vmatpush3.msra.mxu0 %v341_v0  ;;  %1778 = vmatpush3.msra.mxu1 %v341_v0  ;;  %s2689_s15 = smov (!%p256_p4, %s1831_s15), 1  ;;  %v335_v11 = vld [vmem:[%s2653_s1 + $0x10] sm:$0xff]  ;;  %v334_v12 = vld [vmem:[%s2653_s1 + $0x8] sm:$0xff]  ;;  %v333_v15 = vld [vmem:[%s2653_s1] sm:$0xff] }
   0xf   : > { %1681 = vmatprep.subr.mxu0 %v340_v1  ;;  %1770 = vmatprep.subr.mxu1 %v340_v1  ;;  %s1787_s25 = smul.u32 384, %s2689_s15  ;;  %s270_s21 = scalar_lea.vmem %s2654_s2, %s2689_s15 }
  0x10   : > { %1682 = vmatpush3.msra.mxu0 %v340_v1  ;;  %1779 = vmatpush3.msra.mxu1 %v340_v1  ;;  %s276_s24 = scalar_lea.vmem %s2655_s3, %s2689_s15 }
  0x11   : > { %1683 = vmatprep.subr.mxu0 %v339_v2  ;;  %1771 = vmatprep.subr.mxu1 %v339_v2  ;;  %s1905_s30 = scalar_lea.vmem %s2652_s0, %s1787_s25  ;;  %s2509_s28 = scalar_lea.vmem %s2656_s4, %s1787_s25 }
  0x12   : > { %1684 = vmatpush3.msra.mxu0 %v339_v2  ;;  %1780 = vmatpush3.msra.mxu1 %v339_v2  ;;  %v287_v5 = vld [vmem:[%s1905_s30 + $0x10] sm:$0xff]  ;;  %v285_v6 = vld [vmem:[%s1905_s30] sm:$0xff]  ;;  %v288_v9 = vld [vmem:[%s1905_s30 + $0x18] sm:$0xff] }
  0x13   : > { %1814 = vset.pattern.permute.xlu1 %v1841_v4  ;;  %1813 = vset.pattern.permute.xlu0 %v1841_v4  ;;  %v286_v10 = vld [vmem:[%s1905_s30 + $0x8] sm:$0xff]  ;;  %v289_v14 = vld [vmem:[%s1905_s30 + $0x20] sm:$0xff]  ;;  %v292_v18 = vld [vmem:[%s1905_s30 + $0x38] sm:$0xff] }
  0x14   : > { %1685 = vmatprep.subr.mxu0 %v338_v3  ;;  %1772 = vmatprep.subr.mxu1 %v338_v3  ;;  %v290_v13 = vld [vmem:[%s1905_s30 + $0x28] sm:$0xff]  ;;  %v1929_v16 = vld [vmem:[%s1905_s30 + $0xc0] sm:$0xff]  ;;  %v291_v19 = vld [vmem:[%s1905_s30 + $0x30] sm:$0xff] }
  0x15   : > { %1686 = vmatpush3.msra.mxu0 %v338_v3  ;;  %1781 = vmatpush3.msra.mxu1 %v338_v3  ;;  %v1932_v17 = vld [vmem:[%s1905_s30 + $0xc8] sm:$0xff]  ;;  %v1940_v20 = vld [vmem:[%s1905_s30 + $0xd0] sm:$0xff]  ;;  %v1946_v21 = vld [vmem:[%s1905_s30 + $0xd8] sm:$0xff] }
  0x16   : > { %897 = vperm.xlu1 %1814, %v287_v5   ;;  %889 = vperm.xlu0 %1813, %v285_v6   ;;  %v294_v22 = vld [vmem:[%s1905_s30 + $0x48] sm:$0xff]  ;;  %v293_v23 = vld [vmem:[%s1905_s30 + $0x40] sm:$0xff]  ;;  %v296_v26 = vld [vmem:[%s1905_s30 + $0x58] sm:$0xff] }
  0x17   : > { %1687 = vmatprep.subr.mxu0 %v337_v7  ;;  %1773 = vmatprep.subr.mxu1 %v337_v7  ;;  %v1954_v24 = vld [vmem:[%s1905_s30 + $0xe0] sm:$0xff]  ;;  %v1960_v25 = vld [vmem:[%s1905_s30 + $0xe8] sm:$0xff]  ;;  %v295_v27 = vld [vmem:[%s1905_s30 + $0x50] sm:$0xff] }
  0x18   : > { %1688 = vmatpush3.msra.mxu0 %v337_v7  ;;  %1782 = vmatpush3.msra.mxu1 %v337_v7  ;;  %v1968_v28 = vld [vmem:[%s1905_s30 + $0xf0] sm:$0xff]  ;;  %v1974_v29 = vld [vmem:[%s1905_s30 + $0xf8] sm:$0xff]  ;;  %v298_v30 = vld [vmem:[%s1905_s30 + $0x68] sm:$0xff] }
  0x19   : > { %1689 = vmatprep.subr.mxu0 %v336_v8  ;;  %1774 = vmatprep.subr.mxu1 %v336_v8  ;;  %v297_v31 = vld [vmem:[%s1905_s30 + $0x60] sm:$0xff]  ;;  %v1988_v33 = vld [vmem:[%s1905_s30 + $0x108] sm:$0xff]  ;;  %v300_v34 = vld [vmem:[%s1905_s30 + $0x78] sm:$0xff] }
  0x1a   : > { %1690 = vmatpush3.msra.mxu0 %v336_v8  ;;  %1783 = vmatpush3.msra.mxu1 %v336_v8  ;;  %v1982_v32 = vld [vmem:[%s1905_s30 + $0x100] sm:$0xff]  ;;  %v299_v35 = vld [vmem:[%s1905_s30 + $0x70] sm:$0xff]  ;;  %v2002_v37 = vld [vmem:[%s1905_s30 + $0x118] sm:$0xff] }
  0x1b   : > { %901 = vperm.xlu1 %1814, %v288_v9   ;;  %893 = vperm.xlu0 %1813, %v286_v10   ;;  %v1996_v36 = vld [vmem:[%s1905_s30 + $0x110] sm:$0xff]  ;;  %v302_v38 = vld [vmem:[%s1905_s30 + $0x88] sm:$0xff]  ;;  %v301_v39 = vld [vmem:[%s1905_s30 + $0x80] sm:$0xff] }
  0x1c   : > { %1691 = vmatprep.subr.mxu0 %v335_v11  ;;  %1775 = vmatprep.subr.mxu1 %v335_v11  ;;  %v2010_v40 = vld [vmem:[%s1905_s30 + $0x120] sm:$0xff]  ;;  %v322_v41 = vld [vmem:[%s1905_s30 + $0x128] sm:$0xff]  ;;  %v304_v42 = vld [vmem:[%s1905_s30 + $0x98] sm:$0xff] }
  0x1d   : > { %1692 = vmatpush3.msra.mxu0 %v335_v11  ;;  %1784 = vmatpush3.msra.mxu1 %v335_v11  ;;  %v303_v43 = vld [vmem:[%s1905_s30 + $0x90] sm:$0xff]  ;;  %v324_v45 = vld [vmem:[%s1905_s30 + $0x138] sm:$0xff]  ;;  %v306_v46 = vld [vmem:[%s1905_s30 + $0xa8] sm:$0xff] }
  0x1e   : > { %1693 = vmatprep.subr.mxu0 %v334_v12  ;;  %1776 = vmatprep.subr.mxu1 %v334_v12  ;;  %v323_v44 = vld [vmem:[%s1905_s30 + $0x130] sm:$0xff]  ;;  %v305_v47 = vld [vmem:[%s1905_s30 + $0xa0] sm:$0xff]  ;;  %v326_v49 = vld [vmem:[%s1905_s30 + $0x148] sm:$0xff] }
  0x1f   : > { %1694 = vmatpush3.msra.mxu0 %v334_v12  ;;  %1785 = vmatpush3.msra.mxu1 %v334_v12  ;;  %v325_v48 = vld [vmem:[%s1905_s30 + $0x140] sm:$0xff]  ;;  %v308_v50 = vld [vmem:[%s1905_s30 + $0xb8] sm:$0xff]  ;;  %v307_v51 = vld [vmem:[%s1905_s30 + $0xb0] sm:$0xff] }
  0x20   : > { %909 = vperm.xlu1 %1814, %v290_v13   ;;  %905 = vperm.xlu0 %1813, %v289_v14   ;;  %v327_v52 = vld [vmem:[%s1905_s30 + $0x150] sm:$0xff]  ;;  %v328_v53 = vld [vmem:[%s1905_s30 + $0x158] sm:$0xff]  ;;  %v329_v54 = vld [vmem:[%s1905_s30 + $0x160] sm:$0xff] }
  0x21   : > { %1695 = vmatprep.subr.mxu0 %v333_v15  ;;  %1777 = vmatprep.subr.mxu1 %v333_v15  ;;  %v330_v55 = vld [vmem:[%s1905_s30 + $0x168] sm:$0xff]  ;;  %v331_v56 = vld [vmem:[%s1905_s30 + $0x170] sm:$0xff]  ;;  %v332_v57 = vld [vmem:[%s1905_s30 + $0x178] sm:$0xff] }
  0x22   : > { %1696 = vmatpush3.msra.mxu0 %v333_v15  ;;  %1786 = vmatpush3.msra.mxu1 %v333_v15 }
  0x23   : > { %1697 = vmatprep.mubr.msk.f32.mxu0 %vm342_vm0, %v285_v6  ;;  %1733 = vmatprep.mubr.msk.f32.mxu1 %vm342_vm0, %v1929_v16 }
  0x24   : > { %1698 = vmatmul.mubr.msk.f32.vlgmr.msra.gmra.mxu0 %vm342_vm0, %v286_v10  ;;  %1734 = vmatmul.mubr.msk.f32.vlgmr.msra.gmra.mxu1 %vm342_vm0, %v1932_v17 }
  0x25   : > { %917 = vperm.xlu1 %1814, %v292_v18   ;;  %913 = vperm.xlu0 %1813, %v291_v19  }
  0x26   : > { %1700 = vmatprep.mubr.msk.f32.mxu0 %vm342_vm0, %v287_v5  ;;  %1736 = vmatprep.mubr.msk.f32.mxu1 %vm342_vm0, %v1940_v20 }
  0x28   : > { %1701 = vmatmul.mubr.msk.f32.gmra.mxu0 %vm342_vm0, %v288_v9  ;;  %1737 = vmatmul.mubr.msk.f32.gmra.mxu1 %vm342_vm0, %v1946_v21 }
  0x29   : > { %925 = vperm.xlu1 %1814, %v294_v22   ;;  %921 = vperm.xlu0 %1813, %v293_v23  }
  0x2a   : > { %1703 = vmatprep.mubr.msk.f32.mxu0 %vm342_vm0, %v289_v14  ;;  %1739 = vmatprep.mubr.msk.f32.mxu1 %vm342_vm0, %v1954_v24 }
  0x2c   : > { %1704 = vmatmul.mubr.msk.f32.gmra.mxu0 %vm342_vm0, %v290_v13  ;;  %1740 = vmatmul.mubr.msk.f32.gmra.mxu1 %vm342_vm0, %v1960_v25 }
  0x2d   : > { %933 = vperm.xlu1 %1814, %v296_v26   ;;  %929 = vperm.xlu0 %1813, %v295_v27  }
  0x2e   : > { %1706 = vmatprep.mubr.msk.f32.mxu0 %vm342_vm0, %v291_v19  ;;  %1742 = vmatprep.mubr.msk.f32.mxu1 %vm342_vm0, %v1968_v28 }
  0x30   : > { %1707 = vmatmul.mubr.msk.f32.gmra.mxu0 %vm342_vm0, %v292_v18  ;;  %1743 = vmatmul.mubr.msk.f32.gmra.mxu1 %vm342_vm0, %v1974_v29 }
  0x31   : > { %941 = vperm.xlu1 %1814, %v298_v30   ;;  %937 = vperm.xlu0 %1813, %v297_v31  }
  0x32   : > { %1709 = vmatprep.mubr.msk.f32.mxu0 %vm342_vm0, %v293_v23  ;;  %1745 = vmatprep.mubr.msk.f32.mxu1 %vm342_vm0, %v1982_v32 }
  0x34   : > { %1710 = vmatmul.mubr.msk.f32.gmra.mxu0 %vm342_vm0, %v294_v22  ;;  %1746 = vmatmul.mubr.msk.f32.gmra.mxu1 %vm342_vm0, %v1988_v33 }
  0x35   : > { %949 = vperm.xlu1 %1814, %v300_v34   ;;  %945 = vperm.xlu0 %1813, %v299_v35  }
  0x36   : > { %1712 = vmatprep.mubr.msk.f32.mxu0 %vm342_vm0, %v295_v27  ;;  %1748 = vmatprep.mubr.msk.f32.mxu1 %vm342_vm0, %v1996_v36 }
  0x38   : > { %1713 = vmatmul.mubr.msk.f32.gmra.mxu0 %vm342_vm0, %v296_v26  ;;  %1749 = vmatmul.mubr.msk.f32.gmra.mxu1 %vm342_vm0, %v2002_v37 }
  0x39   : > { %957 = vperm.xlu1 %1814, %v302_v38   ;;  %953 = vperm.xlu0 %1813, %v301_v39  }
  0x3a   : > { %1715 = vmatprep.mubr.msk.f32.mxu0 %vm342_vm0, %v297_v31  ;;  %1751 = vmatprep.mubr.msk.f32.mxu1 %vm342_vm0, %v2010_v40 }
  0x3c   : > { %1716 = vmatmul.mubr.msk.f32.gmra.mxu0 %vm342_vm0, %v298_v30  ;;  %1752 = vmatmul.mubr.msk.f32.gmra.mxu1 %vm342_vm0, %v322_v41 }
  0x3d   : > { %965 = vperm.xlu1 %1814, %v304_v42   ;;  %961 = vperm.xlu0 %1813, %v303_v43  }
  0x3e   : > { %1718 = vmatprep.mubr.msk.f32.mxu0 %vm342_vm0, %v299_v35  ;;  %1754 = vmatprep.mubr.msk.f32.mxu1 %vm342_vm0, %v323_v44 }
  0x40   : > { %1719 = vmatmul.mubr.msk.f32.gmra.mxu0 %vm342_vm0, %v300_v34  ;;  %1755 = vmatmul.mubr.msk.f32.gmra.mxu1 %vm342_vm0, %v324_v45 }
  0x41   : > { %973 = vperm.xlu1 %1814, %v306_v46   ;;  %969 = vperm.xlu0 %1813, %v305_v47  }
  0x42   : > { %1721 = vmatprep.mubr.msk.f32.mxu0 %vm342_vm0, %v301_v39  ;;  %1757 = vmatprep.mubr.msk.f32.mxu1 %vm342_vm0, %v325_v48 }
  0x44   : > { %1722 = vmatmul.mubr.msk.f32.gmra.mxu0 %vm342_vm0, %v302_v38  ;;  %1758 = vmatmul.mubr.msk.f32.gmra.mxu1 %vm342_vm0, %v326_v49 }
  0x45   : > { %981 = vperm.xlu1 %1814, %v308_v50   ;;  %977 = vperm.xlu0 %1813, %v307_v51  }
  0x46   : > { %1724 = vmatprep.mubr.msk.f32.mxu0 %vm342_vm0, %v303_v43  ;;  %1760 = vmatprep.mubr.msk.f32.mxu1 %vm342_vm0, %v327_v52 }
  0x48   : > { %1725 = vmatmul.mubr.msk.f32.gmra.mxu0 %vm342_vm0, %v304_v42  ;;  %1761 = vmatmul.mubr.msk.f32.gmra.mxu1 %vm342_vm0, %v328_v53 }
  0x49   : > { %989 = vperm.xlu1 %1814, %v1932_v17   ;;  %985 = vperm.xlu0 %1813, %v1929_v16  }
  0x4a   : > { %1727 = vmatprep.mubr.msk.f32.mxu0 %vm342_vm0, %v305_v47  ;;  %1763 = vmatprep.mubr.msk.f32.mxu1 %vm342_vm0, %v329_v54 }
  0x4c   : > { %1728 = vmatmul.mubr.msk.f32.gmra.mxu0 %vm342_vm0, %v306_v46  ;;  %1764 = vmatmul.mubr.msk.f32.gmra.mxu1 %vm342_vm0, %v330_v55 }
  0x4d   : > { %997 = vperm.xlu1 %1814, %v1946_v21   ;;  %993 = vperm.xlu0 %1813, %v1940_v20  }
  0x4e   : > { %1730 = vmatprep.mubr.msk.f32.mxu0 %vm342_vm0, %v307_v51  ;;  %1766 = vmatprep.mubr.msk.f32.mxu1 %vm342_vm0, %v331_v56 }
  0x50   : > { %1731 = vmatmul.mubr.msk.f32.gmra.mxu0 %vm342_vm0, %v308_v50  ;;  %1767 = vmatmul.mubr.msk.f32.gmra.mxu1 %vm342_vm0, %v332_v57 }
  0x51   : > { %1005 = vperm.xlu1 %1814, %v1960_v25   ;;  %1001 = vperm.xlu0 %1813, %v1954_v24  }
  0x55   : > { %1013 = vperm.xlu1 %1814, %v1974_v29   ;;  %1009 = vperm.xlu0 %1813, %v1968_v28  }
  0x59   : > { %1021 = vperm.xlu1 %1814, %v1988_v33   ;;  %1017 = vperm.xlu0 %1813, %v1982_v32  }
  0x5d   : > { %1029 = vperm.xlu1 %1814, %v2002_v37   ;;  %1025 = vperm.xlu0 %1813, %v1996_v36  }
  0x61   : > { %1037 = vperm.xlu1 %1814, %v322_v41   ;;  %1033 = vperm.xlu0 %1813, %v2010_v40  }
  0x65   : > { %1045 = vperm.xlu1 %1814, %v324_v45   ;;  %1041 = vperm.xlu0 %1813, %v323_v44  }
  0x69   : > { %1053 = vperm.xlu1 %1814, %v326_v49   ;;  %1049 = vperm.xlu0 %1813, %v325_v48  }
  0x6d   : > { %1061 = vperm.xlu1 %1814, %v328_v53   ;;  %1057 = vperm.xlu0 %1813, %v327_v52  }
  0x71   : > { %1069 = vperm.xlu1 %1814, %v330_v55   ;;  %1065 = vperm.xlu0 %1813, %v329_v54  }
  0x75   : > { %1077 = vperm.xlu1 %1814, %v332_v57   ;;  %1073 = vperm.xlu0 %1813, %v331_v56  }
  0x91   : > { %v890_v58 = vpop.permute.xlu0 %889  ;;  %v898_v59 = vpop.permute.xlu1 %897 }
  0x96   : > { %v894_v60 = vpop.permute.xlu0 %893  ;;  %v902_v61 = vpop.permute.xlu1 %901 }
  0x9b   : > { %v906_v62 = vpop.permute.xlu0 %905  ;;  %v910_v63 = vpop.permute.xlu1 %909 }
  0xa0   : > { %v2070_v0 = vpop.permute.xlu0 %913  ;;  %v2072_v1 = vpop.permute.xlu1 %917 }
  0xa4   : > { %v2074_v2 = vpop.permute.xlu0 %921  ;;  %v2076_v3 = vpop.permute.xlu1 %925 }
  0xa8   : > { %v2078_v4 = vpop.permute.xlu0 %929  ;;  %v2080_v5 = vpop.permute.xlu1 %933 }
  0xac   : > { %v2082_v9 = vpop.permute.xlu0 %937  ;;  %v2088_v14 = vpop.permute.xlu1 %941 }
  0xb0   : > { %v2098_v24 = vpop.permute.xlu0 %945  ;;  %v2104_v30 = vpop.permute.xlu1 %949 }
  0xb4   : > { %v2116_v45 = vpop.permute.xlu0 %953  ;;  %v2124_v54 = vpop.permute.xlu1 %957 }
  0xe4   : > { %v1699_v6 = vpop.f32.mrf.mxu0  ;;  %v2084_v10 = vpop.f32.mrf.mxu1 }
  0xe5   : > { %v793_v7 = vmul.f32 0.2, %v1699_v6 }
  0xe6   : > { %v553_v8 = vpop.f32.mrf.mxu0  ;;  %v2094_v20 = vpop.f32.mrf.mxu1 }
  0xe7   : > { %v2086_v11 = vmax.f32 %v1699_v6, %v793_v7  ;;  %v792_v12 = vmul.f32 0.2, %v553_v8 }
  0xe8   : > { %v1702_v13 = vpop.f32.mrf.mxu0  ;;  %v2107_v33 = vpop.f32.mrf.mxu1 }
  0xe9   : > { %v2090_v15 = vmax.f32 %v553_v8, %v792_v12  ;;  %v795_v16 = vmul.f32 0.2, %v1702_v13  ;;  %v1081_v18 = vmul.f32 %v894_v60, %v2086_v11 }
  0xea   : > { %v563_v17 = vpop.f32.mrf.mxu0  ;;  %v2118_v47 = vpop.f32.mrf.mxu1 }
  0xeb   : > { %v1080_v19 = vmul.f32 %v890_v58, %v2090_v15  ;;  %v2096_v21 = vmax.f32 %v1702_v13, %v795_v16  ;;  %v794_v22 = vmul.f32 0.2, %v563_v17  ;;  %v1183_v31 = vmul.f32 %v1081_v18, %v2086_v11  ;;  %v2136_v13 = vpop.permute.xlu0 %961 }
  0xec   : > { %v1705_v23 = vpop.f32.mrf.mxu0  ;;  %v2129_v60 = vpop.f32.mrf.mxu1 }
  0xed   : > { %v1182_v25 = vmul.f32 %v1080_v19, %v2090_v15  ;;  %v2101_v26 = vmax.f32 %v563_v17, %v794_v22  ;;  %v1083_v27 = vmul.f32 %v902_v61, %v2096_v21  ;;  %v797_v28 = vmul.f32 0.2, %v1705_v23 }
  0xee   : > { %v573_v29 = vpop.f32.mrf.mxu0  ;;  %v1128_v32 = vadd.f32 %v1081_v18, %v1080_v19 }
  0xef   : > { %v1082_v34 = vmul.f32 %v898_v59, %v2101_v26  ;;  %v796_v35 = vmul.f32 0.2, %v573_v29  ;;  %v2110_v36 = vmax.f32 %v1705_v23, %v797_v28  ;;  %v1230_v38 = vadd.f32 %v1183_v31, %v1182_v25  ;;  %v2141_v25 = vpop.permute.xlu1 %965 }
  0xf0   : > { %v1708_v37 = vpop.f32.mrf.mxu0  ;;  %v1185_v42 = vmul.f32 %v1083_v27, %v2096_v21 }
  0xf1   : > { %v1129_v39 = vadd.f32 %v1128_v32, %v1082_v34  ;;  %v1184_v40 = vmul.f32 %v1082_v34, %v2101_v26  ;;  %v2113_v41 = vmax.f32 %v573_v29, %v796_v35  ;;  %v799_v43 = vmul.f32 0.2, %v1708_v37 }
  0xf2   : > { %v583_v44 = vpop.f32.mrf.mxu0  ;;  %v1085_v48 = vmul.f32 %v910_v63, %v2110_v36 }
  0xf3   : > { %v1231_v46 = vadd.f32 %v1230_v38, %v1184_v40  ;;  %v1084_v49 = vmul.f32 %v906_v62, %v2113_v41  ;;  %v1130_v50 = vadd.f32 %v1129_v39, %v1083_v27  ;;  %v2122_v51 = vmax.f32 %v1708_v37, %v799_v43  ;;  %v2143_v27 = vpop.f32.mrf.mxu1 }
  0xf4   : > { %v798_v52 = vmul.f32 0.2, %v583_v44  ;;  %v1711_v53 = vpop.f32.mrf.mxu0  ;;  %v1187_v61 = vmul.f32 %v1085_v48, %v2110_v36 }
  0xf5   : > { %v1131_v55 = vadd.f32 %v1130_v50, %v1084_v49  ;;  %v1186_v56 = vmul.f32 %v1084_v49, %v2113_v41  ;;  %v1232_v57 = vadd.f32 %v1231_v46, %v1185_v42  ;;  %v801_v6 = vmul.f32 0.2, %v1711_v53  ;;  %v2154_v42 = vpop.permute.xlu0 %969  ;;  %v2156_v43 = vpop.f32.mrf.mxu1 }
  0xf6   : > { %v2127_v58 = vmax.f32 %v583_v44, %v798_v52  ;;  %v593_v59 = vpop.f32.mrf.mxu0  ;;  %v1087_v7 = vmul.f32 %v2072_v1, %v2122_v51 }
  0xf7   : > { %v1233_v63 = vadd.f32 %v1232_v57, %v1186_v56  ;;  %v1132_v62 = vadd.f32 %v1131_v55, %v1085_v48  ;;  %v2138_v17 = vmax.f32 %v1711_v53, %v801_v6  ;;  %v800_v18 = vmul.f32 0.2, %v593_v59 }
  0xf8   : > { %v1086_v8 = vmul.f32 %v2070_v0, %v2127_v58  ;;  %v1714_v12 = vpop.f32.mrf.mxu0  ;;  %v1189_v0 = vmul.f32 %v1087_v7, %v2122_v51 }
  0xf9   : > { %v1234_v16 = vadd.f32 %v1233_v63, %v1187_v61  ;;  %v2145_v28 = vmax.f32 %v593_v59, %v800_v18  ;;  %v803_v1 = vmul.f32 0.2, %v1714_v12  ;;  %v1089_v34 = vmul.f32 %v2076_v3, %v2138_v17  ;;  %v2161_v3 = vpop.permute.xlu1 %973  ;;  %v2168_v59 = vpop.f32.mrf.mxu1 }
  0xfa   : > { %v1133_v19 = vadd.f32 %v1132_v62, %v1086_v8  ;;  %v1188_v22 = vmul.f32 %v1086_v8, %v2127_v58  ;;  %v603_v23 = vpop.f32.mrf.mxu0 }
  0xfb   : > { %v1088_v35 = vmul.f32 %v2074_v2, %v2145_v28  ;;  %v2152_v38 = vmax.f32 %v1714_v12, %v803_v1  ;;  %v802_v39 = vmul.f32 0.2, %v603_v23  ;;  %v1191_v2 = vmul.f32 %v1089_v34, %v2138_v17  ;;  %v2173_v12 = vpop.permute.xlu0 %977  ;;  %v2180_v1 = vpop.f32.mrf.mxu1 }
  0xfc   : > { %v1235_v29 = vadd.f32 %v1234_v16, %v1188_v22  ;;  %v1134_v31 = vadd.f32 %v1133_v19, %v1087_v7  ;;  %v1717_v32 = vpop.f32.mrf.mxu0 }
  0xfd   : > { %v1190_v46 = vmul.f32 %v1088_v35, %v2145_v28  ;;  %v2159_v48 = vmax.f32 %v603_v23, %v802_v39  ;;  %v805_v49 = vmul.f32 0.2, %v1717_v32  ;;  %v1091_v55 = vmul.f32 %v2080_v5, %v2152_v38  ;;  %v2178_v23 = vpop.permute.xlu1 %981 }
  0xfe   : > { %v1236_v37 = vadd.f32 %v1235_v29, %v1189_v0  ;;  %v613_v40 = vpop.f32.mrf.mxu0  ;;  %v1135_v44 = vadd.f32 %v1134_v31, %v1088_v35 }
  0xff   : > { %v1090_v56 = vmul.f32 %v2078_v4, %v2159_v48  ;;  %v2170_v63 = vmax.f32 %v1717_v32, %v805_v49  ;;  %v804_v62 = vmul.f32 0.2, %v613_v40  ;;  %v1193_v5 = vmul.f32 %v1091_v55, %v2152_v38  ;;  %v2191_v49 = vpop.permute.xlu0 %985 }
 0x100   : > { %v1720_v50 = vpop.f32.mrf.mxu0  ;;  %v1237_v52 = vadd.f32 %v1236_v37, %v1190_v46  ;;  %v1136_v53 = vadd.f32 %v1135_v44, %v1089_v34 }
 0x101   : > { %v1192_v7 = vmul.f32 %v1090_v56, %v2159_v48  ;;  %v2175_v16 = vmax.f32 %v613_v40, %v804_v62  ;;  %v807_v4 = vmul.f32 0.2, %v1720_v50  ;;  %v1093_v0 = vmul.f32 %v2088_v14, %v2170_v63 }
 0x102   : > { %v623_v57 = vpop.f32.mrf.mxu0  ;;  %v1238_v61 = vadd.f32 %v1237_v52, %v1191_v2  ;;  %v1137_v6 = vadd.f32 %v1136_v53, %v1090_v56  ;;  %v2193_v2 = vpop.f32.mrf.mxu1 }
 0x103   : > { %v1092_v29 = vmul.f32 %v2082_v9, %v2175_v16  ;;  %v2186_v32 = vmax.f32 %v1720_v50, %v807_v4  ;;  %v806_v34 = vmul.f32 0.2, %v623_v57  ;;  %v1195_v14 = vmul.f32 %v1093_v0, %v2170_v63 }
 0x104   : > { %v1723_v8 = vpop.f32.mrf.mxu0  ;;  %v1239_v18 = vadd.f32 %v1238_v61, %v1192_v7  ;;  %v1138_v19 = vadd.f32 %v1137_v6, %v1091_v55  ;;  %v2200_v55 = vpop.permute.xlu1 %989 }
 0x105   : > { %v1194_v39 = vmul.f32 %v1092_v29, %v2175_v16  ;;  %v2189_v40 = vmax.f32 %v623_v57, %v806_v34  ;;  %v809_v44 = vmul.f32 0.2, %v1723_v8  ;;  %v1095_v50 = vmul.f32 %v2104_v30, %v2186_v32 }
 0x106   : > { %v633_v22 = vpop.f32.mrf.mxu0  ;;  %v1240_v31 = vadd.f32 %v1239_v18, %v1193_v5  ;;  %v1139_v37 = vadd.f32 %v1138_v19, %v1092_v29  ;;  %v2205_v5 = vpop.f32.mrf.mxu1 }
 0x107   : > { %v1094_v53 = vmul.f32 %v2098_v24, %v2189_v40  ;;  %v2202_v57 = vmax.f32 %v1723_v8, %v809_v44  ;;  %v808_v61 = vmul.f32 0.2, %v633_v22  ;;  %v1197_v19 = vmul.f32 %v1095_v50, %v2186_v32  ;;  %v2210_v24 = vpop.permute.xlu0 %993 }
 0x108   : > { %v1726_v35 = vpop.f32.mrf.mxu0  ;;  %v1241_v52 = vadd.f32 %v1240_v31, %v1194_v39  ;;  %v1140_v9 = vadd.f32 %v1139_v37, %v1093_v0  ;;  %v2220_v44 = vpop.f32.mrf.mxu1 }
 0x109   : > { %v1196_v7 = vmul.f32 %v1094_v53, %v2189_v40  ;;  %v2207_v18 = vmax.f32 %v633_v22, %v808_v61  ;;  %v811_v0 = vmul.f32 0.2, %v1726_v35  ;;  %v1097_v8 = vmul.f32 %v2124_v54, %v2202_v57  ;;  %v2218_v22 = vpop.permute.xlu1 %997 }
 0x10a   : > { %v643_v46 = vpop.f32.mrf.mxu0  ;;  %v1242_v56 = vadd.f32 %v1241_v52, %v1195_v14  ;;  %v1141_v6 = vadd.f32 %v1140_v9, %v1094_v53 }
 0x10b   : > { %v1096_v29 = vmul.f32 %v2116_v45, %v2207_v18  ;;  %v2216_v37 = vmax.f32 %v1726_v35, %v811_v0  ;;  %v810_v39 = vmul.f32 0.2, %v643_v46  ;;  %v1199_v54 = vmul.f32 %v1097_v8, %v2202_v57 }
 0x10c   : > { %v1729_v62 = vpop.f32.mrf.mxu0  ;;  %v1243_v30 = vadd.f32 %v1242_v56, %v1196_v7  ;;  %v1142_v4 = vadd.f32 %v1141_v6, %v1095_v50  ;;  %v2230_v6 = vpop.permute.xlu0 %1001 }
 0x10d   : > { %2666 = vst [vmem:[#allocation2_spill] sm:$0xff] %v2216_v37  ;;  %v1198_v52 = vmul.f32 %v1096_v29, %v2207_v18  ;;  %v2223_v9 = vmax.f32 %v643_v46, %v810_v39  ;;  %v813_v50 = vmul.f32 0.2, %v1729_v62  ;;  %v1099_v35 = vmul.f32 %v2141_v25, %v2216_v37  ;;  %v2232_v7 = vpop.f32.mrf.mxu1 }
 0x10e   : > { %v653_v31 = vpop.f32.mrf.mxu0  ;;  %v1244_v34 = vadd.f32 %v1243_v30, %v1197_v19  ;;  %v1143_v14 = vadd.f32 %v1142_v4, %v1096_v29  ;;  %v2237_v29 = vpop.permute.xlu1 %1005 }
 0x10f   : > { %2667 = vst [vmem:[#allocation3_spill] sm:$0xff] %v2223_v9  ;;  %v1098_v61 = vmul.f32 %v2136_v13, %v2223_v9  ;;  %v2234_v30 = vmax.f32 %v1729_v62, %v813_v50  ;;  %v812_v46 = vmul.f32 0.2, %v653_v31  ;;  %v817_v13 = vmul.f32 0.2, %v2084_v10  ;;  %v2244_v62 = vpop.f32.mrf.mxu1 }
 0x110   : > { %v1245_v53 = vadd.f32 %v1244_v34, %v1198_v52  ;;  %v1144_v56 = vadd.f32 %v1143_v14, %v1097_v8  ;;  %v1732_v45 = vpop.f32.mrf.mxu0  ;;  %v816_v8 = vmul.f32 0.2, %v2094_v20  ;;  %v1201_v14 = vmul.f32 %v1099_v35, %v2216_v37 }
 0x111   : > { %v1200_v0 = vmul.f32 %v1098_v61, %v2223_v9  ;;  %v2240_v34 = vmax.f32 %v653_v31, %v812_v46  ;;  %v815_v25 = vmul.f32 0.2, %v1732_v45  ;;  %v1101_v50 = vmul.f32 %v2161_v3, %v2234_v30  ;;  %v1010_v46 = vpop.permute.xlu0 %1009 }
 0x112   : > { %v1246_v19 = vadd.f32 %v1245_v53, %v1199_v54  ;;  %v1145_v4 = vadd.f32 %v1144_v56, %v1098_v61  ;;  %v663_v39 = vpop.f32.mrf.mxu0  ;;  %v2253_v9 = vmax.f32 %v2094_v20, %v816_v8  ;;  %v818_v37 = vmul.f32 0.2, %v2118_v47 }
 0x113   : > { %v1100_v53 = vmul.f32 %v2154_v42, %v2240_v34  ;;  %v2250_v61 = vmax.f32 %v1732_v45, %v815_v25  ;;  %v814_v31 = vmul.f32 0.2, %v663_v39  ;;  %v819_v42 = vmul.f32 0.2, %v2107_v33  ;;  %v2263_v45 = vpop.f32.mrf.mxu1 }
 0x114   : > { %v1247_v52 = vadd.f32 %v1246_v19, %v1200_v0  ;;  %v1146_v54 = vadd.f32 %v1145_v4, %v1099_v35  ;;  %v2258_v4 = vmax.f32 %v2084_v10, %v817_v13  ;;  %v1014_v0 = vpop.permute.xlu1 %1013  ;;  %v1203_v25 = vmul.f32 %v1101_v50, %v2234_v30 }
 0x115   : > { %2668 = vst [vmem:[#allocation4_spill] sm:$0xff] %v2250_v61  ;;  %v1202_v35 = vmul.f32 %v1100_v53, %v2240_v34  ;;  %v2260_v3 = vmax.f32 %v663_v39, %v814_v31  ;;  %v1103_v8 = vmul.f32 %v2178_v23, %v2250_v61  ;;  %v1104_v10 = vmul.f32 %v2191_v49, %v2253_v9 }
 0x116   : > { %v1248_v56 = vadd.f32 %v1247_v52, %v1201_v14  ;;  %v1147_v19 = vadd.f32 %v1146_v54, %v1100_v53  ;;  %2669 = vst [vmem:[#allocation5_spill] sm:$0xff] %v2258_v4  ;;  %v2273_v39 = vmax.f32 %v2118_v47, %v818_v37  ;;  %v820_v54 = vmul.f32 0.2, %v2143_v27 }
 0x117   : > { %v1102_v52 = vmul.f32 %v2173_v12, %v2260_v3  ;;  %v2280_v23 = vmax.f32 %v2107_v33, %v819_v42  ;;  %v2282_v12 = vpop.f32.mrf.mxu1  ;;  %v821_v49 = vmul.f32 0.2, %v2129_v60  ;;  %v1205_v47 = vmul.f32 %v1103_v8, %v2250_v61 }
 0x118   : > { %v1249_v14 = vadd.f32 %v1248_v56, %v1202_v35  ;;  %v1148_v20 = vadd.f32 %v1147_v19, %v1101_v50  ;;  %2670 = vst [vmem:[#allocation6_spill] sm:$0xff] %v2273_v39  ;;  %v1018_v56 = vpop.permute.xlu0 %1017  ;;  %v1105_v50 = vmul.f32 %v2200_v55, %v2258_v4  ;;  %v1022_v35 = vpop.permute.xlu1 %1021  ;;  %v822_v33 = vmul.f32 0.2, %v2168_v59 }
 0x119   : > { %v1204_v31 = vmul.f32 %v1102_v52, %v2260_v3  ;;  %2671 = vst [vmem:[#allocation7_spill] sm:$0xff] %v2280_v23  ;;  %v1107_v61 = vmul.f32 %v2218_v22, %v2280_v23 }
 0x11a   : > { %v1250_v13 = vadd.f32 %v1249_v14, %v1203_v25  ;;  %v1149_v53 = vadd.f32 %v1148_v20, %v1102_v52  ;;  %v1206_v25 = vmul.f32 %v1104_v10, %v2253_v9  ;;  %v1106_v14 = vmul.f32 %v2210_v24, %v2273_v39 }
 0x11b   : > { %v2290_v20 = vmax.f32 %v2143_v27, %v820_v54  ;;  %v1207_v52 = vmul.f32 %v1105_v50, %v2258_v4 }
 0x11c   : > { %v1150_v37 = vadd.f32 %v1149_v53, %v1103_v8  ;;  %v1251_v19 = vadd.f32 %v1250_v13, %v1204_v31  ;;  %v2296_v8 = vpop.f32.mrf.mxu1  ;;  %v2299_v13 = vmax.f32 %v2129_v60, %v821_v49  ;;  %v823_v53 = vmul.f32 0.2, %v2156_v43  ;;  %v1026_v27 = vpop.permute.xlu0 %1025 }
 0x11d   : > { %v1208_v54 = vmul.f32 %v1106_v14, %v2273_v39  ;;  %v1030_v4 = vpop.permute.xlu1 %1029  ;;  %v1209_v60 = vmul.f32 %v1107_v61, %v2280_v23  ;;  %v825_v49 = vmul.f32 0.2, %v2180_v1 }
 0x11e   : > { %v1151_v55 = vadd.f32 %v1150_v37, %v1104_v10  ;;  %v1252_v42 = vadd.f32 %v1251_v19, %v1205_v47  ;;  %v824_v10 = vmul.f32 0.2, %v2193_v2  ;;  %v1108_v47 = vmul.f32 %v2230_v6, %v2290_v20 }
 0x11f   : > { %v2307_v37 = vmax.f32 %v2168_v59, %v822_v33  ;;  %v2325_v39 = vmax.f32 %v2180_v1, %v825_v49  ;;  %v828_v1 = vmul.f32 0.2, %v2244_v62 }
 0x120   : > { %v1152_v24 = vadd.f32 %v1151_v55, %v1105_v50  ;;  %v1253_v31 = vadd.f32 %v1252_v42, %v1206_v25  ;;  %v2311_v50 = vpop.f32.mrf.mxu1  ;;  %v1109_v25 = vmul.f32 %v2237_v29, %v2299_v13  ;;  %v2316_v55 = vmax.f32 %v2156_v43, %v823_v53  ;;  %v1034_v23 = vpop.permute.xlu0 %1033 }
 0x121   : > { %v2319_v59 = vmax.f32 %v2193_v2, %v824_v10  ;;  %v1210_v33 = vmul.f32 %v1108_v47, %v2290_v20  ;;  %v827_v43 = vmul.f32 0.2, %v2205_v5  ;;  %v1038_v10 = vpop.permute.xlu1 %1037  ;;  %v1113_v49 = vmul.f32 %v1022_v35, %v2325_v39 }
 0x122   : > { %v1153_v22 = vadd.f32 %v1152_v24, %v1106_v14  ;;  %v1254_v19 = vadd.f32 %v1253_v31, %v1207_v52  ;;  %v826_v14 = vmul.f32 0.2, %v2220_v44  ;;  %v1110_v52 = vmul.f32 %v1010_v46, %v2307_v37  ;;  %v2328_v29 = vpop.f32.mrf.mxu1 }
 0x123   : > { %v1111_v2 = vmul.f32 %v1014_v0, %v2316_v55  ;;  %v830_v35 = vmul.f32 0.2, %v2282_v12 }
 0x124   : > { %v1154_v42 = vadd.f32 %v1153_v22, %v1107_v61  ;;  %v1255_v6 = vadd.f32 %v1254_v19, %v1208_v54  ;;  %v1211_v61 = vmul.f32 %v1109_v25, %v2299_v13  ;;  %v1112_v22 = vmul.f32 %v1018_v56, %v2319_v59  ;;  %v763_v0 = vpop.f32.mrf.mxu1 }
 0x125   : > { %v2334_v46 = vmax.f32 %v2220_v44, %v826_v14  ;;  %v1042_v44 = vpop.permute.xlu0 %1041 }
 0x126   : > { %v1155_v24 = vadd.f32 %v1154_v42, %v1108_v47  ;;  %v1256_v31 = vadd.f32 %v1255_v6, %v1209_v60  ;;  %v1212_v47 = vmul.f32 %v1110_v52, %v2307_v37  ;;  %v2340_v42 = vmax.f32 %v2205_v5, %v827_v43  ;;  %v1046_v43 = vpop.permute.xlu1 %1045 }
 0x127   : > { %2672 = vst [vmem:[#allocation8_spill] sm:$0xff] %v2334_v46  ;;  %v829_v6 = vmul.f32 0.2, %v2232_v7  ;;  %v1214_v14 = vmul.f32 %v1112_v22, %v2319_v59 }
 0x128   : > { %v1156_v53 = vadd.f32 %v1155_v24, %v1109_v25  ;;  %v1257_v54 = vadd.f32 %v1256_v31, %v1210_v33  ;;  %v1213_v25 = vmul.f32 %v1111_v2, %v2316_v55  ;;  %v1114_v24 = vmul.f32 %v1026_v27, %v2334_v46 }
 0x12a   : > { %v1157_v19 = vadd.f32 %v1156_v53, %v1110_v52  ;;  %v1258_v60 = vadd.f32 %v1257_v54, %v1211_v61  ;;  %v2347_v52 = vmax.f32 %v2244_v62, %v828_v1  ;;  %v1215_v61 = vmul.f32 %v1113_v49, %v2325_v39  ;;  %v1765_v54 = vpop.f32.mrf.mxu1 }
 0x12b   : > { %v1115_v53 = vmul.f32 %v1030_v4, %v2340_v42  ;;  %v1216_v62 = vmul.f32 %v1114_v24, %v2334_v46  ;;  %v832_v1 = vmul.f32 0.2, %v2311_v50  ;;  %v1050_v4 = vpop.permute.xlu0 %1049  ;;  %v1054_v46 = vpop.permute.xlu1 %1053 }
 0x12c   : > { %v1158_v56 = vadd.f32 %v1157_v19, %v1111_v2  ;;  %v1259_v33 = vadd.f32 %v1258_v60, %v1212_v47  ;;  %v2353_v2 = vmax.f32 %v2232_v7, %v829_v6  ;;  %v831_v47 = vmul.f32 0.2, %v2263_v45  ;;  %v773_v6 = vpop.f32.mrf.mxu1 }
 0x12d   : > { %v2360_v60 = vmax.f32 %v2282_v12, %v830_v35  ;;  %v833_v7 = vmul.f32 0.2, %v2296_v8  ;;  %v834_v12 = vmul.f32 0.2, %v763_v0 }
 0x12e   : > { %v1159_v31 = vadd.f32 %v1158_v56, %v1112_v22  ;;  %v1260_v5 = vadd.f32 %v1259_v33, %v1213_v25  ;;  %2673 = vst [vmem:[#allocation9_spill] sm:$0xff] %v2353_v2  ;;  %v1116_v22 = vmul.f32 %v1034_v23, %v2347_v52  ;;  %v1217_v33 = vmul.f32 %v1115_v53, %v2340_v42 }
 0x12f   : > { %v2369_v23 = vmax.f32 %v2311_v50, %v832_v1  ;;  %v1118_v35 = vmul.f32 %v1042_v44, %v2360_v60  ;;  %v1058_v1 = vpop.permute.xlu0 %1057 }
 0x130   : > { %v1160_v19 = vadd.f32 %v1159_v31, %v1113_v49  ;;  %v1261_v27 = vadd.f32 %v1260_v5, %v1214_v14  ;;  %v1117_v49 = vmul.f32 %v1038_v10, %v2353_v2  ;;  %v2366_v14 = vmax.f32 %v2263_v45, %v831_v47  ;;  %v1768_v45 = vpop.f32.mrf.mxu1 }
 0x131   : > { %v835_v10 = vmul.f32 0.2, %v2328_v29  ;;  %v1220_v44 = vmul.f32 %v1118_v35, %v2360_v60 }
 0x132   : > { %v1262_v25 = vadd.f32 %v1261_v27, %v1215_v61  ;;  %v1161_v56 = vadd.f32 %v1160_v19, %v1114_v24  ;;  %2674 = vst [vmem:[#allocation10_spill] sm:$0xff] %v2366_v14  ;;  %v1218_v24 = vmul.f32 %v1116_v22, %v2347_v52  ;;  %v2374_v27 = vmax.f32 %v2296_v8, %v833_v7  ;;  %v1062_v7 = vpop.permute.xlu1 %1061 }
 0x133   : > { %v1119_v47 = vmul.f32 %v1046_v43, %v2366_v14 }
 0x134   : > { %v1162_v31 = vadd.f32 %v1161_v56, %v1115_v53  ;;  %v1263_v5 = vadd.f32 %v1262_v25, %v1216_v62  ;;  %v1219_v53 = vmul.f32 %v1117_v49, %v2353_v2  ;;  %v1120_v25 = vmul.f32 %v1050_v4, %v2369_v23  ;;  %v783_v2 = vpop.f32.mrf.mxu1 }
 0x135   : > { %v2380_v56 = vmax.f32 %v763_v0, %v834_v12  ;;  %v1221_v43 = vmul.f32 %v1119_v47, %v2366_v14 }
 0x136   : > { %v1163_v61 = vadd.f32 %v1162_v31, %v1116_v22  ;;  %v1264_v19 = vadd.f32 %v1263_v5, %v1217_v33  ;;  %v836_v22 = vmul.f32 0.2, %v773_v6  ;;  %v1121_v31 = vmul.f32 %v1054_v46, %v2374_v27 }
 0x137   : > { %v2385_v5 = vmax.f32 %v2328_v29, %v835_v10  ;;  %v1222_v0 = vmul.f32 %v1120_v25, %v2369_v23  ;;  %v1122_v4 = vmul.f32 %v1058_v1, %v2380_v56 }
 0x138   : > { %v1164_v62 = vadd.f32 %v1163_v61, %v1117_v49  ;;  %v1265_v50 = vadd.f32 %v1264_v19, %v1218_v24  ;;  %v837_v49 = vmul.f32 0.2, %v1765_v54  ;;  %v2390_v12 = vmax.f32 %v773_v6, %v836_v22 }
 0x139   : > { %v1223_v46 = vmul.f32 %v1121_v31, %v2374_v27  ;;  %v1123_v29 = vmul.f32 %v1062_v7, %v2385_v5 }
 0x13a   : > { %v1165_v33 = vadd.f32 %v1164_v62, %v1118_v35  ;;  %v1266_v8 = vadd.f32 %v1265_v50, %v1219_v53  ;;  %v838_v35 = vmul.f32 0.2, %v783_v2  ;;  %v1066_v62 = vpop.permute.xlu0 %1065  ;;  %v2394_v10 = vmax.f32 %v1765_v54, %v837_v49 }
 0x13b   : > { %v839_v50 = vmul.f32 0.2, %v1768_v45  ;;  %v1124_v1 = vmul.f32 %v1066_v62, %v2390_v12 }
 0x13c   : > { %v1166_v24 = vadd.f32 %v1165_v33, %v1119_v47  ;;  %v1267_v61 = vadd.f32 %v1266_v8, %v1220_v44  ;;  %v1070_v44 = vpop.permute.xlu1 %1069  ;;  %v1224_v33 = vmul.f32 %v1122_v4, %v2380_v56  ;;  %v2398_v6 = vmax.f32 %v783_v2, %v838_v35 }
 0x13d   : > { %v1225_v8 = vmul.f32 %v1123_v29, %v2385_v5 }
 0x13e   : > { %v1167_v19 = vadd.f32 %v1166_v24, %v1120_v25  ;;  %v1268_v53 = vadd.f32 %v1267_v61, %v1221_v43  ;;  %v1125_v43 = vmul.f32 %v1070_v44, %v2394_v10  ;;  %v2402_v24 = vmax.f32 %v1768_v45, %v839_v50  ;;  %v1074_v49 = vpop.permute.xlu0 %1073 }
 0x13f   : > { %v1126_v61 = vmul.f32 %v1074_v49, %v2398_v6 }
 0x140   : > { %v1168_v14 = vadd.f32 %v1167_v19, %v1121_v31  ;;  %v1269_v47 = vadd.f32 %v1268_v53, %v1222_v0  ;;  %v1226_v31 = vmul.f32 %v1124_v1, %v2390_v12  ;;  %v1078_v53 = vpop.permute.xlu1 %1077  ;;  %v1227_v2 = vmul.f32 %v1125_v43, %v2394_v10 }
 0x141   : > { %v1228_v45 = vmul.f32 %v1126_v61, %v2398_v6 }
 0x142   : > { %v1169_v22 = vadd.f32 %v1168_v14, %v1122_v4  ;;  %v1270_v25 = vadd.f32 %v1269_v47, %v1223_v46  ;;  %v1127_v14 = vmul.f32 %v1078_v53, %v2402_v24 }
 0x144   : > { %v1170_v54 = vadd.f32 %v1169_v22, %v1123_v29  ;;  %v1271_v7 = vadd.f32 %v1270_v25, %v1224_v33  ;;  %v1229_v29 = vmul.f32 %v1127_v14, %v2402_v24 }
 0x146   : > { %v1171_v0 = vadd.f32 %v1170_v54, %v1124_v1  ;;  %v1272_v19 = vadd.f32 %v1271_v7, %v1225_v8 }
 0x148   : > { %v1172_v4 = vadd.f32 %v1171_v0, %v1125_v43  ;;  %v1273_v35 = vadd.f32 %v1272_v19, %v1226_v31 }
 0x14a   : > { %v1173_v62 = vadd.f32 %v1172_v4, %v1126_v61  ;;  %v1274_v46 = vadd.f32 %v1273_v35, %v1227_v2  ;;  %v1293_v35 = vlaneseq }
 0x14c   : > { %v1174_v50 = vadd.f32 %v1173_v62, %v1127_v14  ;;  %v1275_v47 = vadd.f32 %v1274_v46, %v1228_v45  ;;  %v1294_v62 = vshrl.u32 %v1293_v35, 7  ;;  %v1288_v45 = vld [vmem:[%s270_s21] sm:$0x1] }
 0x14e   : > { %v1175_v44 = vrot.slane %v1174_v50, 4  ;;  %v1276_v33 = vadd.f32 %v1275_v47, %v1229_v29  ;;  %v1295_v46 = vsub.s32 0, %v1294_v62  ;;  %v1290_v47 = vld [vmem:[%s276_s24] sm:$0x1] }
 0x150   : > { %v1176_v22 = vadd.f32 %v1175_v44, %v1174_v50  ;;  %v1277_v1 = vrot.slane %v1276_v33, 4 }
 0x152   : > { %v1177_v25 = vrot.slane %v1176_v22, 2  ;;  %v1278_v8 = vadd.f32 %v1277_v1, %v1276_v33 }
 0x154   : > { %v1178_v54 = vadd.f32 %v1177_v25, %v1176_v22  ;;  %v1279_v7 = vrot.slane %v1278_v8, 2 }
 0x156   : > { %v1179_v49 = vrot.slane %v1178_v54, 1  ;;  %v1280_v43 = vadd.f32 %v1279_v7, %v1278_v8 }
 0x158   : > { %v1180_v31 = vadd.f32 %v1179_v49, %v1178_v54  ;;  %v1281_v0 = vrot.slane %v1280_v43, 1 }
 0x15a   : > { %v1181_v61 = vmul.f32 0.00390625, %v1180_v31  ;;  %v1282_v19 = vadd.f32 %v1281_v0, %v1280_v43 }
 0x15c   : > { %v1283_v53 = vmul.f32 0.00390625, %v1282_v19  ;;  %v1284_v2 = vmul.f32 %v1181_v61, %v1181_v61  ;;  %v2675_v19 = vld [vmem:[#allocation3_spill] sm:$0xff] }
 0x15e   : > { %v1285_v14 = vsub.f32 %v1283_v53, %v1284_v2  ;;  %v2676_v53 = vld [vmem:[#allocation2_spill] sm:$0xff]  ;;  %v2677_v2 = vld [vmem:[#allocation4_spill] sm:$0xff] }
 0x160   : > { %v1286_v4 = vadd.f32 1e-05, %v1285_v14 }
 0x162   : > { %1815 = vrsqrt.f32 %v1286_v4  ;;  %v2680_v4 = vld [vmem:[#allocation7_spill] sm:$0xff] }
 0x16f   : > { %v1816_v29 = vpop.eup %1815 }
 0x170   : > { %v1289_v50 = vmul.f32 %v1816_v29, %v1288_v45  ;;  %v2681_v29 = vld [vmem:[#allocation8_spill] sm:$0xff] }
 0x172   : > { %v1291_v44 = vmul.f32 %v1289_v50, %v1181_v61  ;;  %v1296_v33 = vrot.slane %v1289_v50, %v1295_v46 }
 0x174   : > { %v1292_v22 = vsub.f32 %v1290_v47, %v1291_v44  ;;  %v1297_v1 = vmul.f32 %v1296_v33, %v2090_v15  ;;  %v1298_v25 = vmul.f32 %v1296_v33, %v2086_v11  ;;  %v1299_v8 = vmul.f32 %v1296_v33, %v2101_v26 }
 0x175   : > { %v1300_v54 = vmul.f32 %v1296_v33, %v2096_v21  ;;  %v1301_v7 = vmul.f32 %v1296_v33, %v2113_v41  ;;  %v1302_v49 = vmul.f32 %v1296_v33, %v2110_v36  ;;  %v1303_v43 = vmul.f32 %v1296_v33, %v2127_v58 }
 0x176   : > { %v1304_v31 = vmul.f32 %v1296_v33, %v2122_v51  ;;  %v1305_v0 = vmul.f32 %v1296_v33, %v2145_v28  ;;  %v1306_v61 = vmul.f32 %v1296_v33, %v2138_v17  ;;  %v1307_v15 = vmul.f32 %v1296_v33, %v2159_v48 }
 0x177   : > { %v1308_v11 = vmul.f32 %v1296_v33, %v2152_v38  ;;  %v1309_v26 = vmul.f32 %v1296_v33, %v2175_v16  ;;  %v1310_v21 = vmul.f32 %v1296_v33, %v2170_v63  ;;  %v1311_v41 = vmul.f32 %v1296_v33, %v2189_v40 }
 0x178   : > { %v1312_v36 = vmul.f32 %v1296_v33, %v2186_v32  ;;  %v1313_v58 = vmul.f32 %v1296_v33, %v2207_v18  ;;  %v1314_v51 = vmul.f32 %v1296_v33, %v2202_v57  ;;  %v1315_v28 = vmul.f32 %v1296_v33, %v2675_v19  ;;  %v2678_v32 = vld [vmem:[#allocation5_spill] sm:$0xff]  ;;  %v2679_v18 = vld [vmem:[#allocation6_spill] sm:$0xff] }
 0x179   : > { %v1316_v17 = vmul.f32 %v1296_v33, %v2676_v53  ;;  %v1317_v48 = vmul.f32 %v1296_v33, %v2240_v34  ;;  %v1318_v38 = vmul.f32 %v1296_v33, %v2234_v30  ;;  %v1319_v16 = vmul.f32 %v1296_v33, %v2260_v3 }
 0x17a   : > { %v1320_v63 = vmul.f32 %v1296_v33, %v2677_v2  ;;  %v2443_v40 = vmul.f32 %v1296_v33, %v2253_v9  ;;  %v2446_v14 = vmul.f32 %v1296_v33, %v2678_v32  ;;  %v2449_v57 = vmul.f32 %v1296_v33, %v2679_v18 }
 0x17b   : > { %v2452_v35 = vmul.f32 %v1296_v33, %v2680_v4  ;;  %v2455_v34 = vmul.f32 %v1296_v33, %v2290_v20  ;;  %v2458_v30 = vmul.f32 %v1296_v33, %v2299_v13  ;;  %v2461_v3 = vmul.f32 %v1296_v33, %v2307_v37  ;;  %v2682_v37 = vld [vmem:[#allocation9_spill] sm:$0xff] }
 0x17c   : > { %v2464_v9 = vmul.f32 %v1296_v33, %v2316_v55  ;;  %v2467_v62 = vmul.f32 %v1296_v33, %v2319_v59  ;;  %v2470_v45 = vmul.f32 %v1296_v33, %v2325_v39  ;;  %v2473_v50 = vmul.f32 %v1296_v33, %v2681_v29  ;;  %v2683_v59 = vld [vmem:[#allocation10_spill] sm:$0xff] }
 0x17d   : > { %v2476_v20 = vmul.f32 %v1296_v33, %v2340_v42  ;;  %v2479_v13 = vmul.f32 %v1296_v33, %v2347_v52  ;;  %v2482_v47 = vmul.f32 %v1296_v33, %v2682_v37  ;;  %v2485_v55 = vmul.f32 %v1296_v33, %v2360_v60 }
 0x17e   : > { %v2488_v44 = vmul.f32 %v1296_v33, %v2683_v59  ;;  %v2491_v39 = vmul.f32 %v1296_v33, %v2369_v23  ;;  %v2494_v19 = vmul.f32 %v1296_v33, %v2374_v27  ;;  %v2497_v42 = vmul.f32 %v1296_v33, %v2380_v56 }
 0x17f   : > { %v2500_v52 = vmul.f32 %v1296_v33, %v2385_v5  ;;  %v2502_v53 = vrot.slane %v1292_v22, %v1295_v46  ;;  %v2512_v60 = vmul.f32 %v1296_v33, %v2390_v12  ;;  %v2515_v23 = vmul.f32 %v1296_v33, %v2394_v10 }
 0x180   : > { %v2518_v27 = vmul.f32 %v1296_v33, %v2398_v6  ;;  %v2521_v56 = vmul.f32 %v1296_v33, %v2402_v24 }
 0x181   : > { %v1351_v5 = vadd.f32 %v2502_v53, %v1297_v1  ;;  %v1352_v46 = vadd.f32 %v2502_v53, %v1298_v25  ;;  %v1353_v12 = vadd.f32 %v2502_v53, %v1299_v8  ;;  %v1354_v22 = vadd.f32 %v2502_v53, %v1300_v54 }
 0x182   : > { %v1355_v10 = vadd.f32 %v2502_v53, %v1301_v7  ;;  %v1356_v2 = vadd.f32 %v2502_v53, %v1302_v49  ;;  %v1357_v6 = vadd.f32 %v2502_v53, %v1303_v43  ;;  %v1358_v24 = vadd.f32 %v2502_v53, %v1304_v31 }
 0x183   : > { %v1359_v33 = vadd.f32 %v2502_v53, %v1305_v0  ;;  %v1360_v1 = vadd.f32 %v2502_v53, %v1306_v61  ;;  %v1361_v25 = vadd.f32 %v2502_v53, %v1307_v15  ;;  %v1362_v8 = vadd.f32 %v2502_v53, %v1308_v11  ;;  %1399 = vst [vmem:[%s2509_s28] sm:$0xff] %v1351_v5 }
 0x184   : > { %1400 = vst [vmem:[%s2509_s28 + $0x8] sm:$0xff] %v1352_v46  ;;  %1401 = vst [vmem:[%s2509_s28 + $0x10] sm:$0xff] %v1353_v12  ;;  %v1363_v54 = vadd.f32 %v2502_v53, %v1309_v26  ;;  %v1364_v7 = vadd.f32 %v2502_v53, %v1310_v21  ;;  %v1365_v49 = vadd.f32 %v2502_v53, %v1311_v41 }
 0x185   : > { %1402 = vst [vmem:[%s2509_s28 + $0x18] sm:$0xff] %v1354_v22  ;;  %v1366_v43 = vadd.f32 %v2502_v53, %v1312_v36  ;;  %1403 = vst [vmem:[%s2509_s28 + $0x20] sm:$0xff] %v1355_v10  ;;  %v1367_v31 = vadd.f32 %v2502_v53, %v1313_v58  ;;  %v1368_v0 = vadd.f32 %v2502_v53, %v1314_v51 }
 0x186   : > { %1404 = vst [vmem:[%s2509_s28 + $0x28] sm:$0xff] %v1356_v2  ;;  %1405 = vst [vmem:[%s2509_s28 + $0x30] sm:$0xff] %v1357_v6  ;;  %v1369_v61 = vadd.f32 %v2502_v53, %v1315_v28  ;;  %v1370_v15 = vadd.f32 %v2502_v53, %v1316_v17  ;;  %v1371_v11 = vadd.f32 %v2502_v53, %v1317_v48 }
 0x187   : > { %1406 = vst [vmem:[%s2509_s28 + $0x38] sm:$0xff] %v1358_v24  ;;  %1407 = vst [vmem:[%s2509_s28 + $0x40] sm:$0xff] %v1359_v33  ;;  %v1372_v26 = vadd.f32 %v2502_v53, %v1318_v38  ;;  %v1373_v21 = vadd.f32 %v2502_v53, %v1319_v16  ;;  %v1374_v41 = vadd.f32 %v2502_v53, %v1320_v63 }
 0x188   : > { %1408 = vst [vmem:[%s2509_s28 + $0x48] sm:$0xff] %v1360_v1  ;;  %1409 = vst [vmem:[%s2509_s28 + $0x50] sm:$0xff] %v1361_v25  ;;  %v1375_v36 = vadd.f32 %v2502_v53, %v2443_v40  ;;  %v1376_v58 = vadd.f32 %v2502_v53, %v2446_v14  ;;  %v1377_v51 = vadd.f32 %v2502_v53, %v2449_v57 }
 0x189   : > { %1410 = vst [vmem:[%s2509_s28 + $0x58] sm:$0xff] %v1362_v8  ;;  %1411 = vst [vmem:[%s2509_s28 + $0x60] sm:$0xff] %v1363_v54  ;;  %v1378_v28 = vadd.f32 %v2502_v53, %v2452_v35  ;;  %v1379_v17 = vadd.f32 %v2502_v53, %v2455_v34  ;;  %v1380_v48 = vadd.f32 %v2502_v53, %v2458_v30 }
 0x18a   : > { %1412 = vst [vmem:[%s2509_s28 + $0x68] sm:$0xff] %v1364_v7  ;;  %1413 = vst [vmem:[%s2509_s28 + $0x70] sm:$0xff] %v1365_v49  ;;  %v1381_v38 = vadd.f32 %v2502_v53, %v2461_v3  ;;  %v1382_v16 = vadd.f32 %v2502_v53, %v2464_v9  ;;  %v1383_v63 = vadd.f32 %v2502_v53, %v2467_v62 }
 0x18b   : > { %1414 = vst [vmem:[%s2509_s28 + $0x78] sm:$0xff] %v1366_v43  ;;  %1415 = vst [vmem:[%s2509_s28 + $0x80] sm:$0xff] %v1367_v31  ;;  %v1384_v40 = vadd.f32 %v2502_v53, %v2470_v45  ;;  %v1385_v32 = vadd.f32 %v2502_v53, %v2473_v50  ;;  %v1386_v14 = vadd.f32 %v2502_v53, %v2476_v20 }
 0x18c   : > { %1416 = vst [vmem:[%s2509_s28 + $0x88] sm:$0xff] %v1368_v0  ;;  %1417 = vst [vmem:[%s2509_s28 + $0x90] sm:$0xff] %v1369_v61  ;;  %v1387_v18 = vadd.f32 %v2502_v53, %v2479_v13  ;;  %v1388_v57 = vadd.f32 %v2502_v53, %v2482_v47  ;;  %v1389_v4 = vadd.f32 %v2502_v53, %v2485_v55 }
 0x18d   : > { %1418 = vst [vmem:[%s2509_s28 + $0x98] sm:$0xff] %v1370_v15  ;;  %1419 = vst [vmem:[%s2509_s28 + $0xa0] sm:$0xff] %v1371_v11  ;;  %v1390_v35 = vadd.f32 %v2502_v53, %v2488_v44  ;;  %v1391_v34 = vadd.f32 %v2502_v53, %v2491_v39  ;;  %v1392_v30 = vadd.f32 %v2502_v53, %v2494_v19 }
 0x18e   : > { %1420 = vst [vmem:[%s2509_s28 + $0xa8] sm:$0xff] %v1372_v26  ;;  %1421 = vst [vmem:[%s2509_s28 + $0xb0] sm:$0xff] %v1373_v21  ;;  %v1393_v3 = vadd.f32 %v2502_v53, %v2497_v42  ;;  %v1394_v9 = vadd.f32 %v2502_v53, %v2500_v52  ;;  %v1395_v62 = vadd.f32 %v2502_v53, %v2512_v60 }
 0x18f   : > { %1422 = vst [vmem:[%s2509_s28 + $0xb8] sm:$0xff] %v1374_v41  ;;  %1423 = vst [vmem:[%s2509_s28 + $0xc0] sm:$0xff] %v1375_v36  ;;  %v1396_v45 = vadd.f32 %v2502_v53, %v2515_v23  ;;  %v1397_v29 = vadd.f32 %v2502_v53, %v2518_v27  ;;  %v1398_v50 = vadd.f32 %v2502_v53, %v2521_v56 }
 0x190   : > { %1424 = vst [vmem:[%s2509_s28 + $0xc8] sm:$0xff] %v1376_v58  ;;  %1425 = vst [vmem:[%s2509_s28 + $0xd0] sm:$0xff] %v1377_v51 }
 0x191   : > { %1426 = vst [vmem:[%s2509_s28 + $0xd8] sm:$0xff] %v1378_v28  ;;  %1427 = vst [vmem:[%s2509_s28 + $0xe0] sm:$0xff] %v1379_v17 }
 0x192   : > { %1428 = vst [vmem:[%s2509_s28 + $0xe8] sm:$0xff] %v1380_v48  ;;  %1429 = vst [vmem:[%s2509_s28 + $0xf0] sm:$0xff] %v1381_v38 }
 0x193   : > { %1430 = vst [vmem:[%s2509_s28 + $0xf8] sm:$0xff] %v1382_v16  ;;  %1431 = vst [vmem:[%s2509_s28 + $0x100] sm:$0xff] %v1383_v63 }
 0x194   : > { %1432 = vst [vmem:[%s2509_s28 + $0x108] sm:$0xff] %v1384_v40  ;;  %1433 = vst [vmem:[%s2509_s28 + $0x110] sm:$0xff] %v1385_v32 }
 0x195   : > { %1434 = vst [vmem:[%s2509_s28 + $0x118] sm:$0xff] %v1386_v14  ;;  %1435 = vst [vmem:[%s2509_s28 + $0x120] sm:$0xff] %v1387_v18 }
 0x196   : > { %1436 = vst [vmem:[%s2509_s28 + $0x128] sm:$0xff] %v1388_v57  ;;  %1437 = vst [vmem:[%s2509_s28 + $0x130] sm:$0xff] %v1389_v4 }
 0x197   : > { %1438 = vst [vmem:[%s2509_s28 + $0x138] sm:$0xff] %v1390_v35  ;;  %1439 = vst [vmem:[%s2509_s28 + $0x140] sm:$0xff] %v1391_v34 }
 0x198   : > { %1440 = vst [vmem:[%s2509_s28 + $0x148] sm:$0xff] %v1392_v30  ;;  %1441 = vst [vmem:[%s2509_s28 + $0x150] sm:$0xff] %v1393_v3 }
 0x199   : > { %1442 = vst [vmem:[%s2509_s28 + $0x158] sm:$0xff] %v1394_v9  ;;  %1443 = vst [vmem:[%s2509_s28 + $0x160] sm:$0xff] %v1395_v62 }
 0x19a   : > { %1444 = vst [vmem:[%s2509_s28 + $0x168] sm:$0xff] %v1396_v45  ;;  %1445 = vst [vmem:[%s2509_s28 + $0x170] sm:$0xff] %v1397_v29 }
 0x19b   : > { %1446 = vst [vmem:[%s2509_s28 + $0x178] sm:$0xff] %v1398_v50 }
 0x19c PF: > { %s14_s17 = sadd.s32 1, %s1839_s17   ;;  %s2684_s15 = smov %s1835_s16 }
 0x19d   : > { %p11_p5 = scmp.ge.s32.totalorder %s14_s17, 4   ;;  %s2685_s16 = smov %s2687_s18 }
 0x19f   :  { %13 = sbr.rel (!%p11_p5) target bundleno = 2 (0x2), region = 75 }

</bundles_post_ra>
